<compile_context>
chip_gen: v5e
topology: v5e:2x2
jax: 0.10.0
libtpu: 0.0.40
codegen_flags: <defaults>
</compile_context>

<pallas_src>
import functools
import math

import jax
import jax.numpy as jnp
from jax.experimental import pallas as pl
from jax.experimental.pallas import tpu as pltpu

OUT_PAD = 128  # lane-dense padded width of the final linear output


# ----------------------------------------------------------------------------
# Kernel
# ----------------------------------------------------------------------------
def _big_model_kernel(xs_ref, g_ref,
                      wkv1_ref, wxs_ref, bl2_ref,
                      wl1_ref, bl1_ref,
                      wkv3_ref,
                      w3_ref, b3_ref, w4_ref, b4_ref,
                      out_ref,
                      *, compute_dtype):
    """One grid step = one block of Bt batch elements; everything stays in vregs."""
    Bt, S, D = xs_ref.shape
    _, Qg, G = g_ref.shape
    cd = compute_dtype

    xs_flat = xs_ref[...].reshape(Bt * S, D).astype(cd)       # (Bt*S, D)
    g_flat = g_ref[...].reshape(Bt * Qg, G).astype(cd)        # (Bt*Qg, G)

    # ---- fused K1/V1 projection (from g_embe): one (Bt*Qg, 2D) matmul ----
    kv1 = jnp.dot(g_flat, wkv1_ref[...],
                  preferred_element_type=jnp.float32)          # (Bt*Qg, 2D)
    key1 = kv1[:, :D].reshape(Bt, Qg, D)
    val1 = kv1[:, D:].reshape(Bt, Qg, D)

    # ---- fused xs-path projection: [Q1*scale1 | Wl2 | Q3*scale3] ----
    xsp = jnp.dot(xs_flat, wxs_ref[...],
                  preferred_element_type=jnp.float32)          # (Bt*S, 3D)
    qry1 = xsp[:, :D].reshape(Bt, S, D)                        # pre-scaled by 1/sqrt(G)
    words_emb = xsp[:, D:2 * D] + bl2_ref[...]                 # (Bt*S, D)
    qry3 = xsp[:, 2 * D:].reshape(Bt, S, D)                    # pre-scaled by 1/sqrt(D)

    # ---- attention 1: queries = input_xs rows, keys/values from g_embe ----
    s1 = jnp.einsum("bqd,bkd->bqk", qry1.astype(cd), key1.astype(cd),
                    preferred_element_type=jnp.float32)        # (Bt, S, Qg)
    s1 = s1 - jnp.max(s1, axis=-1, keepdims=True)
    p1 = jnp.exp(s1)
    inv1 = pl.reciprocal(jnp.sum(p1, axis=-1, keepdims=True), approx=True)
    ctx1 = jnp.einsum("bqk,bkd->bqd", (p1 * inv1).astype(cd), val1.astype(cd),
                      preferred_element_type=jnp.float32)      # (Bt, S, D)

    # ---- added_emb = linear1(context1) + linear2(input_xs) ----
    graph_emb = jnp.dot(ctx1.reshape(Bt * S, D).astype(cd), wl1_ref[...],
                        preferred_element_type=jnp.float32) + bl1_ref[...]
    added = graph_emb + words_emb                              # (Bt*S, D)

    # ---- fused K3/V3 projection (from added_emb) ----
    kv3 = jnp.dot(added.astype(cd), wkv3_ref[...],
                  preferred_element_type=jnp.float32)          # (Bt*S, 2D)
    key3 = kv3[:, :D].reshape(Bt, S, D)
    val3 = kv3[:, D:].reshape(Bt, S, D)

    # ---- attention 3 (computed on all S query rows; snippet slice in wrapper) ----
    s3 = jnp.einsum("bqd,bkd->bqk", qry3.astype(cd), key3.astype(cd),
                    preferred_element_type=jnp.float32)        # (Bt, S, S)
    s3 = s3 - jnp.max(s3, axis=-1, keepdims=True)
    p3 = jnp.exp(s3)
    inv3 = pl.reciprocal(jnp.sum(p3, axis=-1, keepdims=True), approx=True)
    ctx3 = jnp.einsum("bqk,bkd->bqd", (p3 * inv3).astype(cd), val3.astype(cd),
                      preferred_element_type=jnp.float32)      # (Bt, S, D)

    # ---- output MLP: linear3 -> tanh -> (lane-padded) linear4 ----
    h = jnp.tanh(jnp.dot(ctx3.reshape(Bt * S, D).astype(cd), w3_ref[...],
                         preferred_element_type=jnp.float32) + b3_ref[...])
    y = jnp.dot(h.astype(cd), w4_ref[...],
                preferred_element_type=jnp.float32) + b4_ref[...]  # (Bt*S, OUT_PAD)
    out_ref[...] = y.reshape(Bt, S, OUT_PAD).astype(out_ref.dtype)


# ----------------------------------------------------------------------------
# One-time parameter fusion (scales folded into weights, lane-padded final linear)
# ----------------------------------------------------------------------------
def prepare_big_model_params(params, compute_dtype=jnp.float32):
    D = params["wq1"].shape[0]          # input_size
    G = params["wk1"].shape[0]          # g_embe_size
    H = params["w3"].shape[1]           # hidden_nodes
    scale1 = 1.0 / math.sqrt(G)         # sdpa1 constructed with dim = g_embe_size
    scale3 = 1.0 / math.sqrt(D)         # sdpa3 constructed with dim = input_size
    cd = compute_dtype

    wkv1 = jnp.concatenate([params["wk1"], params["wv1"]], axis=1).astype(cd)    # (G, 2D)
    # xs-path fusion: [Wq1 * scale1 | Wl2 | Wq3 * scale3] -> (D, 3D)
    wxs = jnp.concatenate([params["wq1"] * scale1,
                           params["wl2"],
                           params["wq3"] * scale3], axis=1).astype(cd)
    wkv3 = jnp.concatenate([params["wk3"], params["wv3"]], axis=1).astype(cd)    # (D, 2D)
    # pad the final linear to OUT_PAD lanes so the output store is lane-dense
    w4p = jnp.zeros((H, OUT_PAD), cd).at[:, :2].set(params["w4"].astype(cd))
    b4p = jnp.zeros((1, OUT_PAD), jnp.float32).at[:, :2].set(
        params["b4"][None, :].astype(jnp.float32))

    fused = {
        "wkv1": wkv1,
        "wxs": wxs,
        "bl2": params["bl2"][None, :].astype(jnp.float32),
        "wl1": params["wl1"].astype(cd),
        "bl1": params["bl1"][None, :].astype(jnp.float32),
        "wkv3": wkv3,
        "w3": params["w3"].astype(cd),
        "b3": params["b3"][None, :].astype(jnp.float32),
        "w4": w4p,
        "b4": b4p,
    }
    # Materialize now so no concat/pad work happens on the forward path.
    return jax.tree_util.tree_map(jax.block_until_ready, fused)


# ----------------------------------------------------------------------------
# Blocking / cost helpers
# ----------------------------------------------------------------------------
def _detect_num_tensorcores():
    """Best-effort TC count (v7x megacore = 2); safe default 1."""
    try:
        dev = jax.devices()[0]
        for attr in ("num_cores", "core_count"):
            v = getattr(dev, attr, None)
            if isinstance(v, int) and v > 0:
                return v
    except Exception:
        pass
    return 1


def _pick_block_batch(B, S, target_rows=128, min_grid=1):
    """Largest divisor of B with Bt*S near target_rows and >= min_grid grid steps."""
    max_bt = max(1, B // min_grid) if B >= min_grid else B
    want = max(1, target_rows // max(S, 1))
    cap = min(want, max_bt)
    bt = 1
    for cand in range(1, B + 1):
        if B % cand == 0 and cand <= cap:
            bt = cand
    return bt


def _cost_estimate(B, S, D, G, Qg, H, cd_bytes):
    flops = 2 * B * (
        Qg * G * 2 * D          # fused K1/V1
        + S * D * 3 * D         # fused xs-path projection
        + 2 * S * Qg * D        # attn1 scores + context
        + S * D * D             # linear1
        + S * D * 2 * D         # fused K3/V3
        + 2 * S * S * D         # attn3 scores + context
        + S * D * H             # linear3
        + S * H * OUT_PAD)      # linear4 (padded)
    transcendentals = B * S * (Qg + S + H)          # exp + tanh (reciprocals ignored)
    weight_elems = (G * 2 * D + D * 3 * D + D + D * D + D + D * 2 * D
                    + D * H + H + H * OUT_PAD + OUT_PAD)
    bytes_accessed = 4 * (B * S * D + B * Qg * G + B * S * OUT_PAD) + cd_bytes * weight_elems
    return pl.CostEstimate(flops=int(flops),
                           transcendentals=int(transcendentals),
                           bytes_accessed=int(bytes_accessed))


# ----------------------------------------------------------------------------
# Forward
# ----------------------------------------------------------------------------
def big_model_forward(input_xs, g_embe, fused, len_quest_ids, *, target_rows=128):
    B, S, D = input_xs.shape
    _, Qg, G = g_embe.shape
    H = fused["w3"].shape[1]
    cd = fused["wxs"].dtype

    num_cores = _detect_num_tensorcores()
    Bt = _pick_block_batch(B, S, target_rows=target_rows, min_grid=num_cores)
    grid = (B // Bt,)

    kernel = functools.partial(_big_model_kernel, compute_dtype=cd)
    full2 = lambda i: (0, 0)

    grid_spec = pltpu.PrefetchScalarGridSpec(
        num_scalar_prefetch=0,
        grid=grid,
        in_specs=[
            pl.BlockSpec((Bt, S, D), lambda i: (i, 0, 0)),    # input_xs
            pl.BlockSpec((Bt, Qg, G), lambda i: (i, 0, 0)),   # g_embe
            pl.BlockSpec((G, 2 * D), full2),                  # [Wk1 | Wv1]
            pl.BlockSpec((D, 3 * D), full2),                  # [Wq1*s1 | Wl2 | Wq3*s3]
            pl.BlockSpec((1, D), full2),                      # b_l2
            pl.BlockSpec((D, D), full2),                      # Wl1
            pl.BlockSpec((1, D), full2),                      # b_l1
            pl.BlockSpec((D, 2 * D), full2),                  # [Wk3 | Wv3]
            pl.BlockSpec((D, H), full2),                      # W3
            pl.BlockSpec((1, H), full2),                      # b3
            pl.BlockSpec((H, OUT_PAD), full2),                # W4 (lane-padded)
            pl.BlockSpec((1, OUT_PAD), full2),                # b4 (lane-padded)
        ],
        out_specs=pl.BlockSpec((Bt, S, OUT_PAD), lambda i: (i, 0, 0)),
    )

    out_full = pl.pallas_call(
        kernel,
        out_shape=jax.ShapeDtypeStruct((B, S, OUT_PAD), jnp.float32),
        grid_spec=grid_spec,
        compiler_params=pltpu.CompilerParams(dimension_semantics=("parallel",)),
        cost_estimate=_cost_estimate(B, S, D, G, Qg, H, jnp.dtype(cd).itemsize),
    )(input_xs, g_embe,
      fused["wkv1"], fused["wxs"], fused["bl2"],
      fused["wl1"], fused["bl1"],
      fused["wkv3"],
      fused["w3"], fused["b3"], fused["w4"], fused["b4"])

    # snippet-row slice and lane un-padding done in the wrapper (keeps kernel
    # matmuls and stores fully aligned / lane-dense).
    return out_full[:, len_quest_ids:S - 1, :2]


# ----------------------------------------------------------------------------
# Pure-JAX reference (mirror of the PyTorch BigModel.forward)
# ----------------------------------------------------------------------------
def _reference(input_xs, g_embe, params, len_quest_ids):
    D = input_xs.shape[-1]
    G = g_embe.shape[-1]

    def sdpa(q, k, v, dim):
        s = jnp.einsum("bqd,bkd->bqk", q, k) / math.sqrt(dim)
        a = jax.nn.softmax(s, axis=-1)
        return jnp.einsum("bqk,bkd->bqd", a, v)

    key1 = g_embe @ params["wk1"]
    val1 = g_embe @ params["wv1"]
    qry1 = input_xs @ params["wq1"]
    ctx1 = sdpa(qry1, key1, val1, G)
    graph_emb = ctx1 @ params["wl1"] + params["bl1"]
    words_emb = input_xs @ params["wl2"] + params["bl2"]
    added = graph_emb + words_emb
    key3 = added @ params["wk3"]
    val3 = added @ params["wv3"]
    snip = input_xs[:, len_quest_ids:-1, :]
    qry3 = snip @ params["wq3"]
    ctx3 = sdpa(qry3, key3, val3, D)
    h = jnp.tanh(ctx3 @ params["w3"] + params["b3"])
    return h @ params["w4"] + params["b4"]


if __name__ == "__main__":
    # input_size D=32, g_embe_size G=16, hidden_nodes H=32
    # batch B=2, seq S=16, g-sequence Qg=8, len_quest_ids=4 -> snippet rows = 11
    B, S, D, G, Qg, H = 2, 16, 32, 16, 8, 32
    len_quest_ids = 4

    key = jax.random.PRNGKey(0)
    ks = jax.random.split(key, 16)
    sd = 0.1
    params = {
        "wk1": sd * jax.random.normal(ks[0], (G, D), jnp.float32),
        "wv1": sd * jax.random.normal(ks[1], (G, D), jnp.float32),
        "wq1": sd * jax.random.normal(ks[2], (D, D), jnp.float32),
        "wl1": sd * jax.random.normal(ks[3], (D, D), jnp.float32),
        "bl1": sd * jax.random.normal(ks[4], (D,), jnp.float32),
        "wl2": sd * jax.random.normal(ks[5], (D, D), jnp.float32),
        "bl2": sd * jax.random.normal(ks[6], (D,), jnp.float32),
        "wk3": sd * jax.random.normal(ks[7], (D, D), jnp.float32),
        "wv3": sd * jax.random.normal(ks[8], (D, D), jnp.float32),
        "wq3": sd * jax.random.normal(ks[9], (D, D), jnp.float32),
        "w3":  sd * jax.random.normal(ks[10], (D, H), jnp.float32),
        "b3":  sd * jax.random.normal(ks[11], (H,), jnp.float32),
        "w4":  sd * jax.random.normal(ks[12], (H, 2), jnp.float32),
        "b4":  sd * jax.random.normal(ks[13], (2,), jnp.float32),
    }
    input_xs = jax.random.normal(ks[14], (B, S, D), jnp.float32)
    g_embe = jax.random.normal(ks[15], (B, Qg, G), jnp.float32)

    ref = _reference(input_xs, g_embe, params, len_quest_ids)

    # f32 matmul operands (default; best on v5e where bf16 VPU is absent)
    fused_f32 = prepare_big_model_params(params, compute_dtype=jnp.float32)
    out = big_model_forward(input_xs, g_embe, fused_f32, len_quest_ids)
    out = jax.block_until_ready(out)
    assert out.shape == (B, S - len_quest_ids - 1, 2)
    assert jnp.allclose(out, ref, atol=5e-3, rtol=5e-3), float(jnp.max(jnp.abs(out - ref)))

    # bf16 matmul operands, f32 accumulation (v6e/v7x MXU fast path)
    fused_bf16 = prepare_big_model_params(params, compute_dtype=jnp.bfloat16)
    out_bf16 = big_model_forward(input_xs, g_embe, fused_bf16, len_quest_ids)
    out_bf16 = jax.block_until_ready(out_bf16)
    assert jnp.allclose(out_bf16, ref, atol=7e-2, rtol=7e-2), float(jnp.max(jnp.abs(out_bf16 - ref)))

    print("KERNEL_OK")
</pallas_src>

<mosaic_0001>
module attributes {stable_mosaic.version = 11 : i64} {
  func.func @_big_model_kernel(%arg0: i32, %arg1: memref<2x16x32xf32, #tpu.memory_space<vmem>>, %arg2: memref<2x8x16xf32, #tpu.memory_space<vmem>>, %arg3: memref<16x64xf32, #tpu.memory_space<vmem>>, %arg4: memref<32x96xf32, #tpu.memory_space<vmem>>, %arg5: memref<1x32xf32, #tpu.memory_space<vmem>>, %arg6: memref<32x32xf32, #tpu.memory_space<vmem>>, %arg7: memref<1x32xf32, #tpu.memory_space<vmem>>, %arg8: memref<32x64xf32, #tpu.memory_space<vmem>>, %arg9: memref<32x32xf32, #tpu.memory_space<vmem>>, %arg10: memref<1x32xf32, #tpu.memory_space<vmem>>, %arg11: memref<32x128xf32, #tpu.memory_space<vmem>>, %arg12: memref<1x128xf32, #tpu.memory_space<vmem>>, %arg13: memref<2x16x128xf32, #tpu.memory_space<vmem>>) attributes {dimension_semantics = [#tpu.dimension_semantics<parallel>], iteration_bounds = array<i64: 1>, scalar_prefetch = 0 : i64, scratch_operands = 0 : i64, tpu.core_type = #tpu.core_type<tc>, window_params = [{transform_indices = @transform_0, window_bounds = array<i64: 2, 16, 32>}, {transform_indices = @transform_1, window_bounds = array<i64: 2, 8, 16>}, {pipeline_mode = #tpu.pipeline_mode<synchronous>, transform_indices = @transform_2, window_bounds = array<i64: 16, 64>}, {pipeline_mode = #tpu.pipeline_mode<synchronous>, transform_indices = @transform_3, window_bounds = array<i64: 32, 96>}, {pipeline_mode = #tpu.pipeline_mode<synchronous>, transform_indices = @transform_4, window_bounds = array<i64: 1, 32>}, {pipeline_mode = #tpu.pipeline_mode<synchronous>, transform_indices = @transform_5, window_bounds = array<i64: 32, 32>}, {pipeline_mode = #tpu.pipeline_mode<synchronous>, transform_indices = @transform_6, window_bounds = array<i64: 1, 32>}, {pipeline_mode = #tpu.pipeline_mode<synchronous>, transform_indices = @transform_7, window_bounds = array<i64: 32, 64>}, {pipeline_mode = #tpu.pipeline_mode<synchronous>, transform_indices = @transform_8, window_bounds = array<i64: 32, 32>}, {pipeline_mode = #tpu.pipeline_mode<synchronous>, transform_indices = @transform_9, window_bounds = array<i64: 1, 32>}, {pipeline_mode = #tpu.pipeline_mode<synchronous>, transform_indices = @transform_10, window_bounds = array<i64: 32, 128>}, {pipeline_mode = #tpu.pipeline_mode<synchronous>, transform_indices = @transform_11, window_bounds = array<i64: 1, 128>}, {transform_indices = @transform_12, window_bounds = array<i64: 2, 16, 128>}]} {
    %c0 = arith.constant 0 : index
    %c0_0 = arith.constant 0 : index
    %c0_1 = arith.constant 0 : index
    %0 = vector.load %arg1[%c0, %c0_0, %c0_1] : memref<2x16x32xf32, #tpu.memory_space<vmem>>, vector<2x16x32xf32>
    %1 = vector.shape_cast %0 : vector<2x16x32xf32> to vector<32x32xf32>
    %c0_2 = arith.constant 0 : index
    %c0_3 = arith.constant 0 : index
    %c0_4 = arith.constant 0 : index
    %2 = vector.load %arg2[%c0_2, %c0_3, %c0_4] : memref<2x8x16xf32, #tpu.memory_space<vmem>>, vector<2x8x16xf32>
    %3 = vector.shape_cast %2 : vector<2x8x16xf32> to vector<16x16xf32>
    %c0_5 = arith.constant 0 : index
    %c0_6 = arith.constant 0 : index
    %4 = vector.load %arg3[%c0_5, %c0_6] : memref<16x64xf32, #tpu.memory_space<vmem>>, vector<16x64xf32>
    %cst = arith.constant dense<0.000000e+00> : vector<16x64xf32>
    %5 = tpu.matmul %3, %4, %cst {dimension_numbers = #tpu.dot_dimension_numbers<[1], [0], [0], [1], [0, 0, 1, 1], [], []>} : vector<16x16xf32>, vector<16x64xf32>, vector<16x64xf32> -> vector<16x64xf32>
    %6 = vector.extract_strided_slice %5 {offsets = [0, 0], sizes = [16, 32], strides = [1, 1]} : vector<16x64xf32> to vector<16x32xf32>
    %7 = vector.shape_cast %6 : vector<16x32xf32> to vector<2x8x32xf32>
    %8 = vector.extract_strided_slice %5 {offsets = [0, 32], sizes = [16, 32], strides = [1, 1]} : vector<16x64xf32> to vector<16x32xf32>
    %9 = vector.shape_cast %8 : vector<16x32xf32> to vector<2x8x32xf32>
    %c0_7 = arith.constant 0 : index
    %c0_8 = arith.constant 0 : index
    %10 = vector.load %arg4[%c0_7, %c0_8] : memref<32x96xf32, #tpu.memory_space<vmem>>, vector<32x96xf32>
    %cst_9 = arith.constant dense<0.000000e+00> : vector<32x96xf32>
    %11 = tpu.matmul %1, %10, %cst_9 {dimension_numbers = #tpu.dot_dimension_numbers<[1], [0], [0], [1], [0, 0, 1, 1], [], []>} : vector<32x32xf32>, vector<32x96xf32>, vector<32x96xf32> -> vector<32x96xf32>
    %12 = vector.extract_strided_slice %11 {offsets = [0, 0], sizes = [32, 32], strides = [1, 1]} : vector<32x96xf32> to vector<32x32xf32>
    %13 = vector.shape_cast %12 : vector<32x32xf32> to vector<2x16x32xf32>
    %14 = vector.extract_strided_slice %11 {offsets = [0, 32], sizes = [32, 32], strides = [1, 1]} : vector<32x96xf32> to vector<32x32xf32>
    %c0_10 = arith.constant 0 : index
    %c0_11 = arith.constant 0 : index
    %15 = vector.load %arg5[%c0_10, %c0_11] : memref<1x32xf32, #tpu.memory_space<vmem>>, vector<1x32xf32>
    %16 = vector.broadcast %15 : vector<1x32xf32> to vector<32x32xf32>
    %17 = arith.addf %14, %16 : vector<32x32xf32>
    %18 = vector.extract_strided_slice %11 {offsets = [0, 64], sizes = [32, 32], strides = [1, 1]} : vector<32x96xf32> to vector<32x32xf32>
    %19 = vector.shape_cast %18 : vector<32x32xf32> to vector<2x16x32xf32>
    "tpu.trace_start"() <{level = 10 : i32, message = "bqd,bkd->bqk"}> : () -> ()
    %cst_12 = arith.constant dense<0.000000e+00> : vector<2x16x8xf32>
    %20 = tpu.matmul %13, %7, %cst_12 {dimension_numbers = #tpu.dot_dimension_numbers<[2], [2], [1], [1], [0, 0, 0, 1, 1, 1], [0], [0]>} : vector<2x16x32xf32>, vector<2x8x32xf32>, vector<2x16x8xf32> -> vector<2x16x8xf32>
    "tpu.trace_stop"() : () -> ()
    %cst_13 = arith.constant dense<0xFF800000> : vector<2x16xf32>
    %21 = vector.multi_reduction <maximumf>, %20, %cst_13 [2] : vector<2x16x8xf32> to vector<2x16xf32>
    %22 = vector.shape_cast %21 : vector<2x16xf32> to vector<2x16x1xf32>
    %23 = vector.broadcast %22 : vector<2x16x1xf32> to vector<2x16x8xf32>
    %24 = arith.subf %20, %23 : vector<2x16x8xf32>
    %25 = math.exp %24 : vector<2x16x8xf32>
    %cst_14 = arith.constant dense<0.000000e+00> : vector<2x16xf32>
    %26 = vector.multi_reduction <add>, %25, %cst_14 [2] : vector<2x16x8xf32> to vector<2x16xf32>
    %27 = vector.shape_cast %26 : vector<2x16xf32> to vector<2x16x1xf32>
    %28 = tpu.reciprocal %27 {approx = true} : vector<2x16x1xf32> -> vector<2x16x1xf32>
    %29 = vector.broadcast %28 : vector<2x16x1xf32> to vector<2x16x8xf32>
    %30 = arith.mulf %25, %29 : vector<2x16x8xf32>
    "tpu.trace_start"() <{level = 10 : i32, message = "bqk,bkd->bqd"}> : () -> ()
    %cst_15 = arith.constant dense<0.000000e+00> : vector<2x16x32xf32>
    %31 = tpu.matmul %30, %9, %cst_15 {dimension_numbers = #tpu.dot_dimension_numbers<[2], [1], [1], [2], [0, 0, 0, 1, 1, 2], [0], [0]>} : vector<2x16x8xf32>, vector<2x8x32xf32>, vector<2x16x32xf32> -> vector<2x16x32xf32>
    "tpu.trace_stop"() : () -> ()
    %32 = vector.shape_cast %31 : vector<2x16x32xf32> to vector<32x32xf32>
    %c0_16 = arith.constant 0 : index
    %c0_17 = arith.constant 0 : index
    %33 = vector.load %arg6[%c0_16, %c0_17] : memref<32x32xf32, #tpu.memory_space<vmem>>, vector<32x32xf32>
    %cst_18 = arith.constant dense<0.000000e+00> : vector<32x32xf32>
    %34 = tpu.matmul %32, %33, %cst_18 {dimension_numbers = #tpu.dot_dimension_numbers<[1], [0], [0], [1], [0, 0, 1, 1], [], []>} : vector<32x32xf32>, vector<32x32xf32>, vector<32x32xf32> -> vector<32x32xf32>
    %c0_19 = arith.constant 0 : index
    %c0_20 = arith.constant 0 : index
    %35 = vector.load %arg7[%c0_19, %c0_20] : memref<1x32xf32, #tpu.memory_space<vmem>>, vector<1x32xf32>
    %36 = vector.broadcast %35 : vector<1x32xf32> to vector<32x32xf32>
    %37 = arith.addf %34, %36 : vector<32x32xf32>
    %38 = arith.addf %37, %17 : vector<32x32xf32>
    %c0_21 = arith.constant 0 : index
    %c0_22 = arith.constant 0 : index
    %39 = vector.load %arg8[%c0_21, %c0_22] : memref<32x64xf32, #tpu.memory_space<vmem>>, vector<32x64xf32>
    %cst_23 = arith.constant dense<0.000000e+00> : vector<32x64xf32>
    %40 = tpu.matmul %38, %39, %cst_23 {dimension_numbers = #tpu.dot_dimension_numbers<[1], [0], [0], [1], [0, 0, 1, 1], [], []>} : vector<32x32xf32>, vector<32x64xf32>, vector<32x64xf32> -> vector<32x64xf32>
    %41 = vector.extract_strided_slice %40 {offsets = [0, 0], sizes = [32, 32], strides = [1, 1]} : vector<32x64xf32> to vector<32x32xf32>
    %42 = vector.shape_cast %41 : vector<32x32xf32> to vector<2x16x32xf32>
    %43 = vector.extract_strided_slice %40 {offsets = [0, 32], sizes = [32, 32], strides = [1, 1]} : vector<32x64xf32> to vector<32x32xf32>
    %44 = vector.shape_cast %43 : vector<32x32xf32> to vector<2x16x32xf32>
    "tpu.trace_start"() <{level = 10 : i32, message = "bqd,bkd->bqk"}> : () -> ()
    %cst_24 = arith.constant dense<0.000000e+00> : vector<2x16x16xf32>
    %45 = tpu.matmul %19, %42, %cst_24 {dimension_numbers = #tpu.dot_dimension_numbers<[2], [2], [1], [1], [0, 0, 0, 1, 1, 1], [0], [0]>} : vector<2x16x32xf32>, vector<2x16x32xf32>, vector<2x16x16xf32> -> vector<2x16x16xf32>
    "tpu.trace_stop"() : () -> ()
    %cst_25 = arith.constant dense<0xFF800000> : vector<2x16xf32>
    %46 = vector.multi_reduction <maximumf>, %45, %cst_25 [2] : vector<2x16x16xf32> to vector<2x16xf32>
    %47 = vector.shape_cast %46 : vector<2x16xf32> to vector<2x16x1xf32>
    %48 = vector.broadcast %47 : vector<2x16x1xf32> to vector<2x16x16xf32>
    %49 = arith.subf %45, %48 : vector<2x16x16xf32>
    %50 = math.exp %49 : vector<2x16x16xf32>
    %cst_26 = arith.constant dense<0.000000e+00> : vector<2x16xf32>
    %51 = vector.multi_reduction <add>, %50, %cst_26 [2] : vector<2x16x16xf32> to vector<2x16xf32>
    %52 = vector.shape_cast %51 : vector<2x16xf32> to vector<2x16x1xf32>
    %53 = tpu.reciprocal %52 {approx = true} : vector<2x16x1xf32> -> vector<2x16x1xf32>
    %54 = vector.broadcast %53 : vector<2x16x1xf32> to vector<2x16x16xf32>
    %55 = arith.mulf %50, %54 : vector<2x16x16xf32>
    "tpu.trace_start"() <{level = 10 : i32, message = "bqk,bkd->bqd"}> : () -> ()
    %cst_27 = arith.constant dense<0.000000e+00> : vector<2x16x32xf32>
    %56 = tpu.matmul %55, %44, %cst_27 {dimension_numbers = #tpu.dot_dimension_numbers<[2], [1], [1], [2], [0, 0, 0, 1, 1, 2], [0], [0]>} : vector<2x16x16xf32>, vector<2x16x32xf32>, vector<2x16x32xf32> -> vector<2x16x32xf32>
    "tpu.trace_stop"() : () -> ()
    %57 = vector.shape_cast %56 : vector<2x16x32xf32> to vector<32x32xf32>
    %c0_28 = arith.constant 0 : index
    %c0_29 = arith.constant 0 : index
    %58 = vector.load %arg9[%c0_28, %c0_29] : memref<32x32xf32, #tpu.memory_space<vmem>>, vector<32x32xf32>
    %cst_30 = arith.constant dense<0.000000e+00> : vector<32x32xf32>
    %59 = tpu.matmul %57, %58, %cst_30 {dimension_numbers = #tpu.dot_dimension_numbers<[1], [0], [0], [1], [0, 0, 1, 1], [], []>} : vector<32x32xf32>, vector<32x32xf32>, vector<32x32xf32> -> vector<32x32xf32>
    %c0_31 = arith.constant 0 : index
    %c0_32 = arith.constant 0 : index
    %60 = vector.load %arg10[%c0_31, %c0_32] : memref<1x32xf32, #tpu.memory_space<vmem>>, vector<1x32xf32>
    %61 = vector.broadcast %60 : vector<1x32xf32> to vector<32x32xf32>
    %62 = arith.addf %59, %61 : vector<32x32xf32>
    %63 = math.tanh %62 : vector<32x32xf32>
    %c0_33 = arith.constant 0 : index
    %c0_34 = arith.constant 0 : index
    %64 = vector.load %arg11[%c0_33, %c0_34] : memref<32x128xf32, #tpu.memory_space<vmem>>, vector<32x128xf32>
    %cst_35 = arith.constant dense<0.000000e+00> : vector<32x128xf32>
    %65 = tpu.matmul %63, %64, %cst_35 {dimension_numbers = #tpu.dot_dimension_numbers<[1], [0], [0], [1], [0, 0, 1, 1], [], []>} : vector<32x32xf32>, vector<32x128xf32>, vector<32x128xf32> -> vector<32x128xf32>
    %c0_36 = arith.constant 0 : index
    %c0_37 = arith.constant 0 : index
    %66 = vector.load %arg12[%c0_36, %c0_37] : memref<1x128xf32, #tpu.memory_space<vmem>>, vector<1x128xf32>
    %67 = vector.broadcast %66 : vector<1x128xf32> to vector<32x128xf32>
    %68 = arith.addf %65, %67 : vector<32x128xf32>
    %69 = vector.shape_cast %68 : vector<32x128xf32> to vector<2x16x128xf32>
    %c0_38 = arith.constant 0 : index
    %c0_39 = arith.constant 0 : index
    %c0_40 = arith.constant 0 : index
    %70 = vector.load %arg13[%c0_38, %c0_39, %c0_40] : memref<2x16x128xf32, #tpu.memory_space<vmem>>, vector<2x16x128xf32>
    tpu.vector_store %arg13[%c0_38, %c0_39, %c0_40], %69 {strides = array<i32>} : memref<2x16x128xf32, #tpu.memory_space<vmem>>, vector<2x16x128xf32>,
    return
  }
  func.func @transform_0(%arg0: i32) -> (i32, i32, i32) {
    %c0_i32 = arith.constant 0 : i32
    %c0_i32_0 = arith.constant 0 : i32
    %c0_i32_1 = arith.constant 0 : i32
    return %arg0, %c0_i32, %c0_i32_0 : i32, i32, i32
  }
  func.func @transform_1(%arg0: i32) -> (i32, i32, i32) {
    %c0_i32 = arith.constant 0 : i32
    %c0_i32_0 = arith.constant 0 : i32
    %c0_i32_1 = arith.constant 0 : i32
    return %arg0, %c0_i32, %c0_i32_0 : i32, i32, i32
  }
  func.func @transform_2(%arg0: i32) -> (i32, i32) {
    %c0_i32 = arith.constant 0 : i32
    %c0_i32_0 = arith.constant 0 : i32
    %c0_i32_1 = arith.constant 0 : i32
    return %c0_i32, %c0_i32_0 : i32, i32
  }
  func.func @transform_3(%arg0: i32) -> (i32, i32) {
    %c0_i32 = arith.constant 0 : i32
    %c0_i32_0 = arith.constant 0 : i32
    %c0_i32_1 = arith.constant 0 : i32
    return %c0_i32, %c0_i32_0 : i32, i32
  }
  func.func @transform_4(%arg0: i32) -> (i32, i32) {
    %c0_i32 = arith.constant 0 : i32
    %c0_i32_0 = arith.constant 0 : i32
    %c0_i32_1 = arith.constant 0 : i32
    return %c0_i32, %c0_i32_0 : i32, i32
  }
  func.func @transform_5(%arg0: i32) -> (i32, i32) {
    %c0_i32 = arith.constant 0 : i32
    %c0_i32_0 = arith.constant 0 : i32
    %c0_i32_1 = arith.constant 0 : i32
    return %c0_i32, %c0_i32_0 : i32, i32
  }
  func.func @transform_6(%arg0: i32) -> (i32, i32) {
    %c0_i32 = arith.constant 0 : i32
    %c0_i32_0 = arith.constant 0 : i32
    %c0_i32_1 = arith.constant 0 : i32
    return %c0_i32, %c0_i32_0 : i32, i32
  }
  func.func @transform_7(%arg0: i32) -> (i32, i32) {
    %c0_i32 = arith.constant 0 : i32
    %c0_i32_0 = arith.constant 0 : i32
    %c0_i32_1 = arith.constant 0 : i32
    return %c0_i32, %c0_i32_0 : i32, i32
  }
  func.func @transform_8(%arg0: i32) -> (i32, i32) {
    %c0_i32 = arith.constant 0 : i32
    %c0_i32_0 = arith.constant 0 : i32
    %c0_i32_1 = arith.constant 0 : i32
    return %c0_i32, %c0_i32_0 : i32, i32
  }
  func.func @transform_9(%arg0: i32) -> (i32, i32) {
    %c0_i32 = arith.constant 0 : i32
    %c0_i32_0 = arith.constant 0 : i32
    %c0_i32_1 = arith.constant 0 : i32
    return %c0_i32, %c0_i32_0 : i32, i32
  }
  func.func @transform_10(%arg0: i32) -> (i32, i32) {
    %c0_i32 = arith.constant 0 : i32
    %c0_i32_0 = arith.constant 0 : i32
    %c0_i32_1 = arith.constant 0 : i32
    return %c0_i32, %c0_i32_0 : i32, i32
  }
  func.func @transform_11(%arg0: i32) -> (i32, i32) {
    %c0_i32 = arith.constant 0 : i32
    %c0_i32_0 = arith.constant 0 : i32
    %c0_i32_1 = arith.constant 0 : i32
    return %c0_i32, %c0_i32_0 : i32, i32
  }
  func.func @transform_12(%arg0: i32) -> (i32, i32, i32) {
    %c0_i32 = arith.constant 0 : i32
    %c0_i32_0 = arith.constant 0 : i32
    %c0_i32_1 = arith.constant 0 : i32
    return %arg0, %c0_i32, %c0_i32_0 : i32, i32, i32
  }
}

</mosaic_0001>

<bundles_post_ra>
// kernel: tpu_custom_call.1
= control target key start
LH: loop header
LB: loop body
LE: loop exit
PB: predicated region body
PF: predicated region fallthrough
CT: control target
= control target key end

     0   :  { %17 = vsyncpa [#allocation3], 0  ;;  %s1442_s0 = inlined_call_operand.hbm [shape: f32[2,16,32], index: 0, kind: input, shape index: {}]   ;;  %s1443_s1 = inlined_call_operand.hbm [shape: f32[2,8,16], index: 1, kind: input, shape index: {}]   ;;  %s1444_s2 = inlined_call_operand.hbm [shape: f32[16,64], index: 2, kind: input, shape index: {}]   ;;  %s1445_s3 = inlined_call_operand.hbm [shape: f32[32,96], index: 3, kind: input, shape index: {}]   ;;  %s1446_s4 = inlined_call_operand.vmem [shape: f32[1,32], index: 4, kind: input, shape index: {}]   ;;  %s1447_s5 = inlined_call_operand.hbm [shape: f32[32,32], index: 5, kind: input, shape index: {}]   ;;  %s1448_s6 = inlined_call_operand.vmem [shape: f32[1,32], index: 6, kind: input, shape index: {}]   ;;  %s1449_s7 = inlined_call_operand.hbm [shape: f32[32,64], index: 7, kind: input, shape index: {}]   ;;  %s1450_s8 = inlined_call_operand.hbm [shape: f32[32,32], index: 8, kind: input, shape index: {}]   ;;  %s1451_s9 = inlined_call_operand.vmem [shape: f32[1,32], index: 9, kind: input, shape index: {}]   ;;  %s1452_s10 = inlined_call_operand.hbm [shape: f32[32,128], index: 10, kind: input, shape index: {}]   ;;  %s1453_s11 = inlined_call_operand.vmem [shape: f32[1,128], index: 11, kind: input, shape index: {}]   ;;  %s1454_s12 = inlined_call_operand.hbm [shape: f32[2,16,128], index: 12, kind: output, shape index: {}]  }
   0x1   :  { %18 = vsyncpa [#allocation6], 0 }
   0x2   :  { %19 = vsyncpa [#allocation9], 0 }
   0x3   :  { %20 = vsyncpa [#allocation12], 0 }
   0x4   :  { %21 = vsyncpa [#allocation15], 0 }
   0x5   :  { %22 = vsyncpa [#allocation4], 0  ;;  %s40_s23 = sshll.u32 %s1443_s1, 4  ;;  %s1207_s24 = smov [#allocation5]   ;;  %s41_s23 = int_to_ptr.hbm [resolvable:$true] %s40_s23 }
   0x6   :  { %s42_s25 = sshll.u32 %s1207_s24, 4  ;;  %s66_s28 = sshll.u32 %s1445_s3, 4  ;;  %s43_s25 = int_to_ptr.vmem [resolvable:$true] %s42_s25  ;;  %s67_s28 = int_to_ptr.hbm [resolvable:$true] %s66_s28 }
   0x7   :  { %s1208_s29 = smov 128   ;;  %s1209_s30 = smov 8  }
   0x8   :  { %48 = dma.hbm_to_vmem [thread:$0]  %s41_s23, 256, %s43_s25, [#allocation6], %s1208_s29, %s1208_s29, %s1209_s30  }
   0x9   :  { %s1210_s13 = smov [#allocation8]   ;;  %s96_s1 = sshll.u32 %s1449_s7, 4  ;;  %s97_s1 = int_to_ptr.hbm [resolvable:$true] %s96_s1 }
   0xa   :  { %s68_s14 = sshll.u32 %s1210_s13, 4  ;;  %s27_s18 = sshll.u32 %s1442_s0, 4  ;;  %s69_s14 = int_to_ptr.vmem [resolvable:$true] %s68_s14  ;;  %s28_s18 = int_to_ptr.hbm [resolvable:$true] %s27_s18 }
   0xb   :  { %74 = dma.hbm_to_vmem [thread:$0]  %s67_s28, 512, %s69_s14, [#allocation9], %s1208_s29, %s1208_s29, %s1209_s30  }
   0xc   :  { %s1211_s19 = smov [#allocation11]   ;;  %s1212_s21 = smov [#allocation2]  }
   0xd   :  { %s98_s20 = sshll.u32 %s1211_s19, 4  ;;  %s29_s7 = sshll.u32 %s1212_s21, 4  ;;  %s99_s20 = int_to_ptr.vmem [resolvable:$true] %s98_s20  ;;  %s30_s7 = int_to_ptr.vmem [resolvable:$true] %s29_s7 }
   0xe   :  { %104 = dma.hbm_to_vmem [thread:$0]  %s97_s1, 512, %s99_s20, [#allocation12], %s1208_s29, %s1208_s29, %s1209_s30  }
   0xf   :  { %s53_s24 = sshll.u32 %s1444_s2, 4  ;;  %s81_s26 = sshll.u32 %s1447_s5, 4  ;;  %s54_s24 = int_to_ptr.hbm [resolvable:$true] %s53_s24  ;;  %s82_s26 = int_to_ptr.hbm [resolvable:$true] %s81_s26 }
  0x10   :  { %35 = dma.hbm_to_vmem [thread:$0]  %s28_s18, 512, %s30_s7, [#allocation3], %s1208_s29, %s1208_s29, %s1209_s30  }
  0x11   :  { %s1213_s27 = smov [#allocation7]   ;;  %s1214_s13 = smov [#allocation10]  }
  0x12   :  { %s55_s28 = sshll.u32 %s1213_s27, 4  ;;  %s83_s2 = sshll.u32 %s1214_s13, 4  ;;  %s56_s28 = int_to_ptr.vmem [resolvable:$true] %s55_s28  ;;  %s84_s2 = int_to_ptr.vmem [resolvable:$true] %s83_s2 }
  0x13   :  { %61 = dma.hbm_to_vmem [thread:$0]  %s54_s24, 256, %s56_s28, [#allocation6], %s1208_s29, %s1208_s29, %s1209_s30  }
  0x14   :  { %s109_s16 = sshll.u32 %s1450_s8, 4  ;;  %s124_s3 = sshll.u32 %s1452_s10, 4  ;;  %s110_s16 = int_to_ptr.hbm [resolvable:$true] %s109_s16  ;;  %s125_s3 = int_to_ptr.hbm [resolvable:$true] %s124_s3 }
  0x15   :  { %89 = dma.hbm_to_vmem [thread:$0]  %s82_s26, 512, %s84_s2, [#allocation9], %s1208_s29, %s1208_s29, %s1209_s30  }
  0x16   :  { %s1215_s17 = smov [#allocation13]   ;;  %s1216_s19 = smov [#allocation14]  }
  0x17   :  { %s111_s18 = sshll.u32 %s1215_s17, 4  ;;  %s126_s8 = sshll.u32 %s1216_s19, 4  ;;  %s112_s18 = int_to_ptr.vmem [resolvable:$true] %s111_s18  ;;  %s127_s8 = int_to_ptr.vmem [resolvable:$true] %s126_s8 }
  0x18   :  { %117 = dma.hbm_to_vmem [thread:$0]  %s110_s16, 512, %s112_s18, [#allocation12], %s1208_s29, %s1208_s29, %s1209_s30  }
  0x19   :  { %132 = dma.hbm_to_vmem [thread:$0]  %s125_s3, 512, %s127_s8, [#allocation15], %s1208_s29, %s1208_s29, %s1209_s30  }
  0x1a   :  { %1195 = dma.done.wait [#allocation3], 512  }
  0x1b   :  { %1196 = vsyncadd [#allocation3], 4294966784 }
  0x1c   :  { %1197 = dma.done.wait [#allocation6], 512  }
  0x1d   :  { %1198 = vsyncadd [#allocation6], 4294966784 }
  0x1e   :  { %1199 = dma.done.wait [#allocation9], 1024  }
  0x1f   :  { %1200 = vsyncadd [#allocation9], 4294966272 }
  0x20   :  { %1201 = dma.done.wait [#allocation12], 1024  }
  0x21   :  { %1202 = vsyncadd [#allocation12], 4294966272 }
  0x22   :  { %1203 = dma.done.wait [#allocation15], 512  }
  0x23   :  { %1204 = vsyncadd [#allocation15], 4294966784  ;;  %v174_v0 = vld [vmem:[#allocation7 + $0x8] sm:$0xff]  ;;  %v173_v2 = vld [vmem:[#allocation7] sm:$0xff]  ;;  %vm175_vm0 = vcmask 130048   ;;  %vm209_vm1 = vcmask 261120  }
  0x24   :  { %v208_v1 = vld [vmem:[#allocation8 + $0x18] sm:$0xff]  ;;  %196 = vmatpush.msra.mxu2 %v174_v0  ;;  %v207_v3 = vld [vmem:[#allocation8 + $0x10] sm:$0xff]  ;;  %v171_v4 = vld [vmem:[#allocation5] sm:$0xff]  ;;  %vm325_vm2 = vcmask 64512   ;;  %s1217_s10 = smov 96   ;;  %s1218_s7 = smov 32  }
  0x25   :  { %234 = vmatpush.msra.mxu1 %v208_v1  ;;  %v206_v5 = vld [vmem:[#allocation8 + $0x8] sm:$0xff]  ;;  %v205_v6 = vld [vmem:[#allocation8] sm:$0xff]  ;;  %v169_v10 = vld [vmem:[#allocation2 + $0x10] sm:$0xff]  ;;  %s1220_s25 = smov [#allocation16]   ;;  %s848_s13 = sshll.u32 %s1454_s12, 4  ;;  %s849_s13 = int_to_ptr.hbm [resolvable:$true] %s848_s13 }
  0x26   :  { %197 = vmatpush.msra.mxu2 %v173_v2  ;;  %v167_v7 = vld [vmem:[#allocation2] sm:$0xff]  ;;  %v172_v8 = vld [vmem:[#allocation5 + $0x8] sm:$0xff]  ;;  %v170_v11 = vld [vmem:[#allocation2 + $0x18] sm:$0xff]  ;;  %s846_s26 = sshll.u32 %s1220_s25, 4  ;;  %s847_s26 = int_to_ptr.vmem [resolvable:$true] %s846_s26 }
  0x27   :  { %235 = vmatpush.msra.mxu1 %v207_v3  ;;  %865 = vmatmul.msk.f32.vlgmr.msra.gmra.mxu2 %vm175_vm0, %v171_v4  ;;  %v168_v9 = vld [vmem:[#allocation2 + $0x8] sm:$0xff]  ;;  %v935_v47 = vld [vmem:[%s1446_s4] ss:$0 sm:$0xff]  ;;  %s1219_s4 = smov 64   ;;  %v437_v2 = vld [vmem:[#allocation10 + $0x18] sm:$0xff] }
  0x28   :  { %v436_v3 = vld [vmem:[#allocation10 + $0x10] sm:$0xff]  ;;  %v435_v4 = vld [vmem:[#allocation10 + $0x8] sm:$0xff] }
  0x29   :  { %236 = vmatpush.msra.mxu1 %v206_v5  ;;  %v434_v5 = vld [vmem:[#allocation10] sm:$0xff] }
  0x2b   :  { %237 = vmatpush.msra.mxu1 %v205_v6 }
  0x2c   :  { %867 = vmatmul.msk.f32.vlgmr.msra.gmra.mxu1 %vm209_vm1, %v167_v7 }
  0x2f   :  { %866 = vmatmul.msk.f32.gmra.mxu2 %vm175_vm0, %v172_v8  ;;  %v506_v8 = vld [vmem:[#allocation11 + $0x18] sm:$0xff] }
  0x34   :  { %868 = vmatmul.msk.f32.gmra.mxu1 %vm209_vm1, %v168_v9 }
  0x3c   :  { %869 = vmatmul.msk.f32.gmra.mxu1 %vm209_vm1, %v169_v10 }
  0x44   :  { %870 = vmatmul.msk.f32.gmra.mxu1 %vm209_vm1, %v170_v11  ;;  %v505_v11 = vld [vmem:[#allocation11 + $0x10] sm:$0xff] }
  0xa9   :  { %v1340_v12 = vpop.f32.mrf.mxu1 }
  0xaa   :  { %v199_v13 = vpop.f32.mrf.mxu2 }
  0xab   :  { %871 = vmatpush.xpose.msk.msrb.mxu2 %vm209_vm1, %v199_v13 }
  0xae   :  { %872 = vmatmul.msk.f32.vlgmr.msrb.gmra.mxu2 %vm209_vm1, %v1340_v12 }
  0xb1   :  { %v1345_v14 = vpop.f32.mrf.mxu1 }
  0xb2   :  { %v202_v15 = vpop.f32.mrf.mxu2 }
  0xb3   :  { %874 = vmatpush.xpose.msk.msra.mxu3 %vm209_vm1, %v202_v15 }
  0xb6   :  { %873 = vmatmul.msk.f32.gmra.mxu2 %vm209_vm1, %v1345_v14 }
  0xb7   :  { %466 = vmatpush.msrb.mxu3 %v437_v2 }
  0xb9   :  { %v1350_v16 = vpop.f32.mrf.mxu1  ;;  %467 = vmatpush.msrb.mxu3 %v436_v3 }
  0xba   :  { %875 = vmatmul.msk.f32.vlgmr.msra.gmra.mxu3 %vm209_vm1, %v1350_v16 }
  0xbb   :  { %468 = vmatpush.msrb.mxu3 %v435_v4 }
  0xbd   :  { %469 = vmatpush.msrb.mxu3 %v434_v5 }
  0xc1   :  { %v1354_v17 = vpop.f32.mrf.mxu1 }
  0xc2   :  { %876 = vmatmul.msk.f32.gmra.mxu3 %vm209_vm1, %v1354_v17 }
 0x131   :  { %v287_v18 = vpop.f32.mrf.mxu2 }
 0x132   :  { %v326_v19 = vsel %vm325_vm2, %v287_v18, -inf }
 0x133   :  { %327 = vmax.xlane.f32.xlu0 %v326_v19 }
 0x139   :  { %v290_v20 = vpop.f32.mrf.mxu2 }
 0x13a   :  { %v329_v21 = vsel %vm325_vm2, %v290_v20, -inf }
 0x13b   :  { %330 = vmax.xlane.f32.xlu0 %v329_v21 }
 0x13d   :  { %v319_v22 = vpop.f32.mrf.mxu3 }
 0x13e   :  { %v332_v23 = vsel %vm325_vm2, %v319_v22, -inf }
 0x13f   :  { %333 = vmax.xlane.f32.xlu1 %v332_v23 }
 0x145   :  { %v322_v24 = vpop.f32.mrf.mxu3 }
 0x146   :  { %v335_v25 = vsel %vm325_vm2, %v322_v24, -inf }
 0x147   :  { %336 = vmax.xlane.f32.xlu1 %v335_v25 }
 0x14f   :  { %370 = vrot.lane.b32.xlu0 %v199_v13, %s1217_s10  ;;  %v503_v13 = vld [vmem:[#allocation11] sm:$0xff] }
 0x1a6   :  { %v328_v26 = vpop.xlane.xlu0 %327 }
 0x1a7   :  { %v338_v27 = vsub.f32 %v287_v18, %v328_v26 }
 0x1a9   :  { %v342_v28 = vmul.f32 1.442695, %v338_v27 }
 0x1ab   :  { %939 = vpow2.f32 %v342_v28 }
 0x1ae   :  { %v331_v29 = vpop.xlane.xlu0 %330 }
 0x1af   :  { %v339_v30 = vsub.f32 %v290_v20, %v331_v29 }
 0x1b1   :  { %v940_v31 = vpop.eup %939  ;;  %v344_v32 = vmul.f32 1.442695, %v339_v30 }
 0x1b2   :  { %v334_v33 = vpop.xlane.xlu1 %333  ;;  %v350_v35 = vsel %vm325_vm2, %v940_v31, 0.0 }
 0x1b3   :  { %v340_v34 = vsub.f32 %v319_v22, %v334_v33  ;;  %941 = vpow2.f32 %v344_v32  ;;  %351 = vadd.xlane.f32.xlu2 %v350_v35 }
 0x1b5   :  { %v346_v36 = vmul.f32 1.442695, %v340_v34 }
 0x1b7   :  { %943 = vpow2.f32 %v346_v36 }
 0x1b9   :  { %v942_v37 = vpop.eup %941 }
 0x1ba   :  { %v337_v38 = vpop.xlane.xlu1 %336  ;;  %v353_v40 = vsel %vm325_vm2, %v942_v37, 0.0 }
 0x1bb   :  { %v341_v39 = vsub.f32 %v322_v24, %v337_v38  ;;  %354 = vadd.xlane.f32.xlu2 %v353_v40 }
 0x1bd   :  { %v944_v41 = vpop.eup %943  ;;  %v348_v42 = vmul.f32 1.442695, %v341_v39 }
 0x1be   :  { %v356_v43 = vsel %vm325_vm2, %v944_v41, 0.0 }
 0x1bf   :  { %945 = vpow2.f32 %v348_v42  ;;  %357 = vadd.xlane.f32.xlu1 %v356_v43 }
 0x1c1   :  { %v371_v44 = vpop.permute.xlu0 %370 }
 0x1c2   :  { %394 = vmatpush.msra.mxu0 %v371_v44 }
 0x1c4   :  { %531 = vmatpush.msrb.mxu0 %v506_v8 }
 0x1c5   :  { %v946_v45 = vpop.eup %945 }
 0x1c6   :  { %v359_v46 = vsel %vm325_vm2, %v946_v45, 0.0  ;;  %532 = vmatpush.msrb.mxu0 %v505_v11 }
 0x1c7   :  { %360 = vadd.xlane.f32.xlu2 %v359_v46 }
 0x1d8   :  { %402 = vrot.lane.b32.xlu1 %v202_v15, %s1217_s10 }
 0x1df   :  { %254 = vrot.lane.b32.xlu2 %v935_v47, %s1218_s7 }
 0x226   :  { %v352_v48 = vpop.xlane.xlu2 %351 }
 0x227   :  { %947 = vrcp.f32 %v352_v48 }
 0x22d   :  { %v948_v49 = vpop.eup %947 }
 0x22e   :  { %v355_v50 = vpop.xlane.xlu2 %354  ;;  %v366_v51 = vmul.f32 %v948_v49, %v940_v31 }
 0x22f   :  { %949 = vrcp.f32 %v355_v50 }
 0x230   :  { %877 = vmatmul.msk.f32.vlgmr.msra.gmra.mxu0 %vm325_vm2, %v366_v51 }
 0x232   :  { %v358_v55 = vpop.xlane.xlu1 %357 }
 0x233   :  { %951 = vrcp.f32 %v358_v55 }
 0x235   :  { %v950_v52 = vpop.eup %949 }
 0x236   :  { %v367_v53 = vmul.f32 %v950_v52, %v942_v37 }
 0x238   :  { %878 = vmatmul.msk.f32.gmra.mxu0 %vm325_vm2, %v367_v53 }
 0x239   :  { %v952_v60 = vpop.eup %951 }
 0x23a   :  { %v361_v54 = vpop.xlane.xlu2 %360  ;;  %v368_v61 = vmul.f32 %v952_v60, %v944_v41 }
 0x23b   :  { %953 = vrcp.f32 %v361_v54 }
 0x241   :  { %v954_v0 = vpop.eup %953 }
 0x242   :  { %v255_v56 = vpop.permute.xlu2 %254  ;;  %v369_v1 = vmul.f32 %v954_v0, %v946_v45 }
 0x243   :  { %v260_v57 = vadd.f32 %v255_v56, %v1354_v17  ;;  %v259_v58 = vadd.f32 %v255_v56, %v1350_v16  ;;  %v257_v59 = vadd.f32 %v255_v56, %v1340_v12  ;;  %v258_v63 = vadd.f32 %v255_v56, %v1345_v14 }
 0x245   :  { %493 = vrot.lane.b32.xlu1 %v260_v57, %s1217_s10  ;;  %491 = vrot.lane.b32.xlu2 %v259_v58, %s1217_s10 }
 0x246   :  { %487 = vrot.lane.b32.xlu0 %v257_v59, %s1217_s10 }
 0x24a   :  { %v403_v62 = vpop.permute.xlu1 %402 }
 0x24b   :  { %426 = vmatpush.msra.mxu2 %v403_v62 }
 0x24c   :  { %879 = vmatmul.msk.f32.vlgmr.msra.gmra.mxu2 %vm325_vm2, %v368_v61 }
 0x24d   :  { %585 = vrot.lane.b32.xlu1 %v1350_v16, %s1219_s4  ;;  %550 = vrot.lane.b32.xlu2 %v1345_v14, %s1219_s4  ;;  %v936_v14 = vld [vmem:[%s1448_s6] ss:$0 sm:$0xff] }
 0x24e   :  { %489 = vrot.lane.b32.xlu0 %v258_v63, %s1217_s10 }
 0x254   :  { %880 = vmatmul.msk.f32.gmra.mxu2 %vm325_vm2, %v369_v1 }
 0x256   :  { %548 = vrot.lane.b32.xlu0 %v1340_v12, %s1219_s4  ;;  %v504_v12 = vld [vmem:[#allocation11 + $0x8] sm:$0xff] }
 0x257   :  { %533 = vmatpush.msrb.mxu0 %v504_v12  ;;  %v739_v12 = vld [vmem:[#allocation13 + $0x18] sm:$0xff] }
 0x259   :  { %534 = vmatpush.msrb.mxu0 %v503_v13  ;;  %v738_v13 = vld [vmem:[#allocation13 + $0x10] sm:$0xff] }
 0x25e   :  { %587 = vrot.lane.b32.xlu0 %v1354_v17, %s1219_s4 }
 0x29f   :  { %v492_v25 = vpop.permute.xlu2 %491 }
 0x2a7   :  { %v551_v35 = vpop.permute.xlu2 %550 }
 0x2ad   :  { %v396_v6 = vpop.f32.mrf.mxu0 }
 0x2ae   :  { %881 = vmatmul.msk.f32.vlgmr.msrb.gmra.mxu3 %vm209_vm1, %v396_v6 }
 0x2b5   :  { %v399_v7 = vpop.f32.mrf.mxu0 }
 0x2b6   :  { %882 = vmatmul.msk.f32.gmra.mxu3 %vm209_vm1, %v399_v7 }
 0x2b7   :  { %v494_v29 = vpop.permute.xlu1 %493 }
 0x2b8   :  { %v488_v15 = vpop.permute.xlu0 %487 }
 0x2bf   :  { %v586_v38 = vpop.permute.xlu1 %585 }
 0x2c0   :  { %v490_v21 = vpop.permute.xlu0 %489 }
 0x2c8   :  { %v549_v34 = vpop.permute.xlu0 %548 }
 0x2cf   :  { %v428_v9 = vpop.f32.mrf.mxu2 }
 0x2d0   :  { %883 = vmatmul.msk.f32.gmra.mxu3 %vm209_vm1, %v428_v9  ;;  %v588_v39 = vpop.permute.xlu0 %587 }
 0x2d7   :  { %v431_v10 = vpop.f32.mrf.mxu2 }
 0x2d8   :  { %884 = vmatmul.msk.f32.gmra.mxu3 %vm209_vm1, %v431_v10 }
 0x331   :  { %v471_v16 = vpop.f32.mrf.mxu3 }
 0x332   :  { %v472_v17 = vadd.f32 %v936_v14, %v471_v16 }
 0x334   :  { %v499_v18 = vadd.f32 %v488_v15, %v472_v17  ;;  %v737_v15 = vld [vmem:[#allocation13 + $0x8] sm:$0xff] }
 0x336   :  { %885 = vmatmul.msk.f32.vlgmr.msrb.gmra.mxu0 %vm209_vm1, %v499_v18 }
 0x339   :  { %v474_v19 = vpop.f32.mrf.mxu3 }
 0x33a   :  { %v475_v20 = vadd.f32 %v936_v14, %v474_v19 }
 0x33c   :  { %v500_v22 = vadd.f32 %v490_v21, %v475_v20 }
 0x33e   :  { %886 = vmatmul.msk.f32.gmra.mxu0 %vm209_vm1, %v500_v22 }
 0x353   :  { %v477_v23 = vpop.f32.mrf.mxu3 }
 0x354   :  { %v478_v24 = vadd.f32 %v936_v14, %v477_v23 }
 0x356   :  { %v501_v26 = vadd.f32 %v492_v25, %v478_v24 }
 0x358   :  { %887 = vmatmul.msk.f32.gmra.mxu0 %vm209_vm1, %v501_v26  ;;  %v736_v26 = vld [vmem:[#allocation13] sm:$0xff] }
 0x35b   :  { %v480_v27 = vpop.f32.mrf.mxu3 }
 0x35c   :  { %v481_v28 = vadd.f32 %v936_v14, %v480_v27 }
 0x35e   :  { %v502_v30 = vadd.f32 %v494_v29, %v481_v28 }
 0x360   :  { %888 = vmatmul.msk.f32.gmra.mxu0 %vm209_vm1, %v502_v30 }
 0x3b3   :  { %v536_v31 = vpop.f32.mrf.mxu0 }
 0x3bb   :  { %v539_v32 = vpop.f32.mrf.mxu0 }
 0x3bc   :  { %v925_v33 = vpack.i.bf16 %v536_v31, %v539_v32  ;;  %889 = vmatpush.xpose.msk.msrb.mxu2 %vm209_vm1, %v539_v32  ;;  %v791_v32 = vld [vmem:[#allocation14 + $0x10] sm:$0xff] }
 0x3c0   :  { %890 = vmatpush.xpose.msk.msrb.mxu2 %vm209_vm1, %v536_v31  ;;  %v792_v31 = vld [vmem:[#allocation14 + $0x18] sm:$0xff] }
 0x3c1   :  { %821 = vmatpush.msra.mxu0 %v792_v31 }
 0x3c3   :  { %891 = vmatmul.msk.f32.vlgmr.msrb.gmra.mxu2 %vm209_vm1, %v549_v34  ;;  %822 = vmatpush.msra.mxu0 %v791_v32  ;;  %v789_v34 = vld [vmem:[#allocation14] sm:$0xff] }
 0x3cb   :  { %892 = vmatmul.msk.f32.gmra.mxu2 %vm209_vm1, %v551_v35  ;;  %v937_v35 = vld [vmem:[%s1451_s9] ss:$0 sm:$0xff] }
 0x3d5   :  { %v542_v36 = vpop.f32.mrf.mxu0 }
 0x3dd   :  { %v545_v37 = vpop.f32.mrf.mxu0 }
 0x3de   :  { %893 = vmatpush.xpose.msk.msrb.mxu1 %vm209_vm1, %v545_v37  ;;  %909 = vmatpush.xpose.msk.msra.mxu3 %vm209_vm1, %v545_v37  ;;  %v930_v2 = vpack.i.bf16 %v542_v36, %v545_v37 }
 0x3e2   :  { %894 = vmatpush.xpose.msk.msrb.mxu1 %vm209_vm1, %v542_v36  ;;  %910 = vmatpush.xpose.msk.msra.mxu3 %vm209_vm1, %v542_v36 }
 0x3e5   :  { %895 = vmatmul.msk.f32.vlgmr.msrb.gmra.mxu1 %vm209_vm1, %v586_v38  ;;  %896 = vmatmul.msk.f32.vlgmr.msra.gmra.mxu3 %vm209_vm1, %v588_v39 }
 0x3e6   :  { %768 = vmatpush.msra.mxu1 %v739_v12 }
 0x3e8   :  { %769 = vmatpush.msra.mxu1 %v738_v13 }
 0x3ea   :  { %770 = vmatpush.msra.mxu1 %v737_v15 }
 0x3ec   :  { %771 = vmatpush.msra.mxu1 %v736_v26 }
 0x446   :  { %v579_v40 = vpop.f32.mrf.mxu2 }
 0x447   :  { %v622_v41 = vsel %vm175_vm0, %v579_v40, -inf }
 0x448   :  { %623 = vmax.xlane.f32.xlu2 %v622_v41 }
 0x44e   :  { %v582_v42 = vpop.f32.mrf.mxu2 }
 0x44f   :  { %v625_v43 = vsel %vm175_vm0, %v582_v42, -inf }
 0x450   :  { %626 = vmax.xlane.f32.xlu1 %v625_v43 }
 0x462   :  { %v616_v44 = vpop.f32.mrf.mxu1 }
 0x463   :  { %v628_v45 = vsel %vm175_vm0, %v616_v44, -inf }
 0x464   :  { %629 = vmax.xlane.f32.xlu0 %v628_v45 }
 0x468   :  { %v619_v46 = vpop.f32.mrf.mxu3 }
 0x469   :  { %v631_v47 = vsel %vm175_vm0, %v619_v46, -inf }
 0x46a   :  { %632 = vmax.xlane.f32.xlu2 %v631_v47 }
 0x478   :  { %926 = vrot.lane.b32.xlu0 %v925_v33, %s1217_s10  ;;  %v790_v33 = vld [vmem:[#allocation14 + $0x8] sm:$0xff] }
 0x479   :  { %823 = vmatpush.msra.mxu0 %v790_v33 }
 0x47b   :  { %824 = vmatpush.msra.mxu0 %v789_v34 }
 0x4bb   :  { %v624_v48 = vpop.xlane.xlu2 %623 }
 0x4bc   :  { %v634_v49 = vsub.f32 %v579_v40, %v624_v48  ;;  %v938_v48 = vld [vmem:[%s1453_s11] ss:$0 sm:$0xff] }
 0x4be   :  { %v638_v50 = vmul.f32 1.442695, %v634_v49 }
 0x4c0   :  { %955 = vpow2.f32 %v638_v50 }
 0x4c3   :  { %v627_v51 = vpop.xlane.xlu1 %626 }
 0x4c4   :  { %v635_v52 = vsub.f32 %v582_v42, %v627_v51 }
 0x4c6   :  { %v956_v53 = vpop.eup %955  ;;  %v640_v54 = vmul.f32 1.442695, %v635_v52 }
 0x4c7   :  { %v646_v55 = vsel %vm175_vm0, %v956_v53, 0.0 }
 0x4c8   :  { %957 = vpow2.f32 %v640_v54  ;;  %647 = vadd.xlane.f32.xlu1 %v646_v55 }
 0x4ce   :  { %v958_v56 = vpop.eup %957 }
 0x4cf   :  { %v649_v57 = vsel %vm175_vm0, %v958_v56, 0.0 }
 0x4d0   :  { %650 = vadd.xlane.f32.xlu2 %v649_v57 }
 0x4d7   :  { %v630_v58 = vpop.xlane.xlu0 %629 }
 0x4d8   :  { %v636_v59 = vsub.f32 %v616_v44, %v630_v58 }
 0x4da   :  { %v642_v60 = vmul.f32 1.442695, %v636_v59 }
 0x4dc   :  { %959 = vpow2.f32 %v642_v60 }
 0x4dd   :  { %v633_v61 = vpop.xlane.xlu2 %632 }
 0x4de   :  { %v637_v62 = vsub.f32 %v619_v46, %v633_v61 }
 0x4e0   :  { %v644_v63 = vmul.f32 1.442695, %v637_v62 }
 0x4e2   :  { %v960_v0 = vpop.eup %959  ;;  %961 = vpow2.f32 %v644_v63 }
 0x4e3   :  { %v652_v1 = vsel %vm175_vm0, %v960_v0, 0.0 }
 0x4e4   :  { %653 = vadd.xlane.f32.xlu1 %v652_v1 }
 0x4e8   :  { %v962_v3 = vpop.eup %961  ;;  %931 = vrot.lane.b32.xlu2 %v930_v2, %s1217_s10 }
 0x4e9   :  { %v655_v6 = vsel %vm175_vm0, %v962_v3, 0.0 }
 0x4ea   :  { %v927_v4 = vpop.permute.xlu0 %926 }
 0x4eb   :  { %v928_v5 = vunpack.i.l.bf16 %v927_v4  ;;  %v929_v7 = vunpack.i.h.bf16 %v927_v4 }
 0x4ec   :  { %656 = vadd.xlane.f32.xlu1 %v655_v6 }
 0x4ed   :  { %692 = vmatpush.msra.mxu2 %v928_v5 }
 0x4ef   :  { %693 = vmatpush.msra.mxu2 %v929_v7 }
 0x53b   :  { %v648_v8 = vpop.xlane.xlu1 %647 }
 0x53c   :  { %963 = vrcp.f32 %v648_v8 }
 0x542   :  { %v964_v9 = vpop.eup %963 }
 0x543   :  { %v662_v10 = vmul.f32 %v964_v9, %v956_v53  ;;  %v651_v11 = vpop.xlane.xlu2 %650 }
 0x544   :  { %965 = vrcp.f32 %v651_v11 }
 0x545   :  { %897 = vmatmul.msk.f32.vlgmr.msra.gmra.mxu2 %vm175_vm0, %v662_v10 }
 0x54a   :  { %v966_v14 = vpop.eup %965 }
 0x54b   :  { %v932_v16 = vpop.permute.xlu2 %931  ;;  %v663_v17 = vmul.f32 %v966_v14, %v958_v56 }
 0x54c   :  { %v933_v18 = vunpack.i.l.bf16 %v932_v16  ;;  %v934_v19 = vunpack.i.h.bf16 %v932_v16 }
 0x54d   :  { %898 = vmatmul.msk.f32.gmra.mxu2 %vm175_vm0, %v663_v17 }
 0x54e   :  { %727 = vmatpush.msrb.mxu3 %v933_v18 }
 0x550   :  { %728 = vmatpush.msrb.mxu3 %v934_v19 }
 0x557   :  { %v654_v20 = vpop.xlane.xlu1 %653 }
 0x558   :  { %967 = vrcp.f32 %v654_v20 }
 0x55e   :  { %v968_v21 = vpop.eup %967 }
 0x55f   :  { %v664_v22 = vmul.f32 %v968_v21, %v960_v0  ;;  %v657_v23 = vpop.xlane.xlu1 %656 }
 0x560   :  { %969 = vrcp.f32 %v657_v23 }
 0x561   :  { %899 = vmatmul.msk.f32.vlgmr.msrb.gmra.mxu3 %vm175_vm0, %v664_v22 }
 0x566   :  { %v970_v24 = vpop.eup %969 }
 0x567   :  { %v665_v25 = vmul.f32 %v970_v24, %v962_v3 }
 0x569   :  { %900 = vmatmul.msk.f32.gmra.mxu3 %vm175_vm0, %v665_v25 }
 0x5c8   :  { %v695_v27 = vpop.f32.mrf.mxu2 }
 0x5c9   :  { %901 = vmatmul.msk.f32.vlgmr.msra.gmra.mxu1 %vm209_vm1, %v695_v27 }
 0x5d0   :  { %v698_v28 = vpop.f32.mrf.mxu2 }
 0x5d1   :  { %902 = vmatmul.msk.f32.gmra.mxu1 %vm209_vm1, %v698_v28 }
 0x5e4   :  { %v730_v29 = vpop.f32.mrf.mxu3 }
 0x5e5   :  { %903 = vmatmul.msk.f32.gmra.mxu1 %vm209_vm1, %v730_v29 }
 0x5ec   :  { %v733_v30 = vpop.f32.mrf.mxu3 }
 0x5ed   :  { %904 = vmatmul.msk.f32.gmra.mxu1 %vm209_vm1, %v733_v30 }
 0x646   :  { %v773_v36 = vpop.f32.mrf.mxu1 }
 0x647   :  { %v774_v37 = vadd.f32 %v937_v35, %v773_v36 }
 0x649   :  { %971 = vtanh.f32 %v774_v37 }
 0x64e   :  { %v776_v38 = vpop.f32.mrf.mxu1 }
 0x64f   :  { %v972_v39 = vpop.eup %971  ;;  %v777_v40 = vadd.f32 %v937_v35, %v776_v38 }
 0x650   :  { %905 = vmatmul.msk.f32.vlgmr.msra.gmra.mxu0 %vm209_vm1, %v972_v39 }
 0x651   :  { %973 = vtanh.f32 %v777_v40 }
 0x657   :  { %v974_v41 = vpop.eup %973 }
 0x658   :  { %906 = vmatmul.msk.f32.gmra.mxu0 %vm209_vm1, %v974_v41 }
 0x662   :  { %v779_v42 = vpop.f32.mrf.mxu1 }
 0x663   :  { %v780_v43 = vadd.f32 %v937_v35, %v779_v42 }
 0x665   :  { %975 = vtanh.f32 %v780_v43 }
 0x66a   :  { %v782_v44 = vpop.f32.mrf.mxu1 }
 0x66b   :  { %v976_v45 = vpop.eup %975  ;;  %v783_v46 = vadd.f32 %v937_v35, %v782_v44 }
 0x66c   :  { %907 = vmatmul.msk.f32.gmra.mxu0 %vm209_vm1, %v976_v45 }
 0x66d   :  { %977 = vtanh.f32 %v783_v46 }
 0x673   :  { %v978_v47 = vpop.eup %977 }
 0x674   :  { %908 = vmatmul.msk.f32.gmra.mxu0 %vm209_vm1, %v978_v47 }
 0x6cd   :  { %v826_v49 = vpop.f32.mrf.mxu0 }
 0x6ce   :  { %v827_v50 = vadd.f32 %v938_v48, %v826_v49 }
 0x6d0   :  { %838 = vst [vmem:[#allocation16] sm:$0xff] %v827_v50 }
 0x6d5   :  { %v829_v51 = vpop.f32.mrf.mxu0 }
 0x6d6   :  { %v830_v52 = vadd.f32 %v938_v48, %v829_v51 }
 0x6d8   :  { %839 = vst [vmem:[#allocation16 + $0x8] sm:$0xff] %v830_v52 }
 0x6e9   :  { %v832_v53 = vpop.f32.mrf.mxu0 }
 0x6ea   :  { %v833_v54 = vadd.f32 %v938_v48, %v832_v53 }
 0x6ec   :  { %840 = vst [vmem:[#allocation16 + $0x10] sm:$0xff] %v833_v54 }
 0x6f1   :  { %v835_v55 = vpop.f32.mrf.mxu0 }
 0x6f2   :  { %v836_v56 = vadd.f32 %v938_v48, %v835_v55 }
 0x6f4   :  { %841 = vst [vmem:[#allocation16 + $0x18] sm:$0xff] %v836_v56 }
 0x6f5   :  { %854 = dma.vmem_to_hbm [thread:$0]  %s847_s26, 512, %s849_s13, [#allocation4], %s1208_s29, %s1208_s29, %s1209_s30  }
 0x6f6   :  { %1205 = dma.done.wait [#allocation4], 512  }
 0x6f7   :  { %1206 = vsyncadd [#allocation4], 4294966784 }
 0x6f8   :  { %859 = vsyncpa [#allocation3], 1 }
 0x6f9   :  { %860 = vsyncpa [#allocation6], 1 }
 0x6fa   :  { %861 = vsyncpa [#allocation9], 1 }
 0x6fb   :  { %862 = vsyncpa [#allocation12], 1 }
 0x6fc   :  { %863 = vsyncpa [#allocation15], 1 }
 0x6fd   :  { %864 = vsyncpa [#allocation4], 1 }

</bundles_post_ra>
